<compile_context>
chip_gen: v5e
topology: v5e:2x2
jax: 0.10.0
libtpu: 0.0.40
codegen_flags: <defaults>
</compile_context>

<pallas_src>
import functools

import jax
import jax.numpy as jnp
from jax.experimental import pallas as pl
from jax.experimental.pallas import tpu as pltpu

# ---- synthetic "config" ----------------------------------------------------
N_EMBD = 32
N_HEAD = 4
HEAD_SIZE = N_EMBD // N_HEAD
BLOCK_SIZE = 8          # max sequence length (tril buffer size)
LN_EPS = 1e-5


# ---- fused transformer-Block kernel -----------------------------------------
def block_kernel(x_ref, wqkv_ref, wproj_ref, w1_ref, w2_ref, vec_ref, o_ref,
                 *, batch, seq):
    N, C = x_ref.shape            # N = batch*seq rows, C = n_embd
    H = N_HEAD
    hs = C // H
    scale = C ** (-0.5)           # PyTorch Head scales by n_embd**-0.5 (matches module)

    x = x_ref[...]                                   # (N, C)

    vecs = vec_ref[...]                              # (8, 4C) packed small params
    g1, be1 = vecs[0:1, :C], vecs[1:2, :C]
    g2, be2 = vecs[2:3, :C], vecs[3:4, :C]
    bproj, bf2 = vecs[4:5, :C], vecs[5:6, :C]
    bf1 = vecs[6:7, :]                               # (1, 4C)

    # ---- LayerNorm 1 ----
    mu = jnp.mean(x, axis=-1, keepdims=True)
    var = jnp.mean((x - mu) ** 2, axis=-1, keepdims=True)
    xn = (x - mu) * jax.lax.rsqrt(var + LN_EPS) * g1 + be1

    # ---- fused QKV: one lane-dense (N, C) @ (C, 3C) MXU push ----
    qkv = jnp.dot(xn, wqkv_ref[...], preferred_element_type=jnp.float32)   # (N, 3C)

    # ---- causal attention: per-head static unroll, batched over batch ----
    row = jax.lax.broadcasted_iota(jnp.int32, (seq, seq), 0)
    col = jax.lax.broadcasted_iota(jnp.int32, (seq, seq), 1)
    causal = (col <= row)[None]   # (1, T, T); every row keeps its diagonal -> -inf is safe

    head_outs = []
    for h in range(H):            # static unroll; at T=8/hs=8 these are latency-bound
        qh = qkv[:, h * hs:(h + 1) * hs].reshape(batch, seq, hs)
        kh = qkv[:, C + h * hs:C + (h + 1) * hs].reshape(batch, seq, hs)
        vh = qkv[:, 2 * C + h * hs:2 * C + (h + 1) * hs].reshape(batch, seq, hs)
        s = jnp.einsum('btd,bsd->bts', qh, kh,
                       preferred_element_type=jnp.float32) * scale         # (B, T, T)
        s = jnp.where(causal, s, -jnp.inf)
        m = jnp.max(s, axis=-1, keepdims=True)
        p = jnp.exp(s - m)
        p = p / jnp.sum(p, axis=-1, keepdims=True)   # exact divide (accuracy is free here)
        # TODO(synk): attention / residual dropout omitted (eval mode, config.dropout == 0)
        head_outs.append(jnp.einsum('bts,bsd->btd', p, vh,
                                    preferred_element_type=jnp.float32))   # (B, T, hs)

    attn = jnp.concatenate(head_outs, axis=-1).reshape(N, C)   # head concat -> (N, C)

    # ---- output projection: one (N, C) @ (C, C) matmul ----
    sa = jnp.dot(attn, wproj_ref[...], preferred_element_type=jnp.float32) + bproj
    x1 = x + sa                                                 # residual 1

    # ---- LayerNorm 2 ----
    mu2 = jnp.mean(x1, axis=-1, keepdims=True)
    var2 = jnp.mean((x1 - mu2) ** 2, axis=-1, keepdims=True)
    x2n = (x1 - mu2) * jax.lax.rsqrt(var2 + LN_EPS) * g2 + be2

    # ---- FeedForward: Linear(C, 4C) -> ReLU -> Linear(4C, C) ----
    h1 = jnp.dot(x2n, w1_ref[...], preferred_element_type=jnp.float32) + bf1
    h1 = jnp.maximum(h1, 0.0)
    ff = jnp.dot(h1, w2_ref[...], preferred_element_type=jnp.float32) + bf2

    o_ref[...] = x1 + ff                                        # residual 2


def transformer_block(x, packed):
    B, T, C = x.shape
    FC = 4 * C
    N = B * T
    wqkv, wproj, w1, w2, vecs = packed
    x2d = x.reshape(N, C)         # 2D boundary: lane-dense rows, no in-kernel 3D relayout

    kernel = functools.partial(block_kernel, batch=B, seq=T)

    # Single grid step: whole problem (~20 KiB of weights + 2 KiB activations) fits
    # trivially in VMEM on v5e/v6e/v7x; splitting only adds per-step overhead.
    grid_spec = pltpu.PrefetchScalarGridSpec(
        num_scalar_prefetch=0,
        grid=(1,),
        in_specs=[
            pl.BlockSpec((N, C), lambda i: (0, 0)),            # x rows
            pl.BlockSpec((C, 3 * C), lambda i: (0, 0)),        # fused qkv weight (dense 2D)
            pl.BlockSpec((C, C), lambda i: (0, 0)),            # proj weight (dense 2D)
            pl.BlockSpec((C, FC), lambda i: (0, 0)),           # ffn w1
            pl.BlockSpec((FC, C), lambda i: (0, 0)),           # ffn w2
            pl.BlockSpec((8, FC), lambda i: (0, 0)),           # packed biases/LN params (1 vreg)
        ],
        out_specs=pl.BlockSpec((N, C), lambda i: (0, 0)),
    )
    out2d = pl.pallas_call(
        kernel,
        out_shape=jax.ShapeDtypeStruct((N, C), jnp.float32),
        grid_spec=grid_spec,
        compiler_params=pltpu.CompilerParams(dimension_semantics=("arbitrary",)),
    )(x2d, wqkv, wproj, w1, w2, vecs)
    return out2d.reshape(B, T, C)


# ---- deterministic parameter init (same layout as before) -------------------
def init_params(key, C):
    ks = jax.random.split(key, 8)
    std = 0.02
    wq = std * jax.random.normal(ks[0], (C, C), jnp.float32)          # x @ wq
    wk = std * jax.random.normal(ks[1], (C, C), jnp.float32)
    wv = std * jax.random.normal(ks[2], (C, C), jnp.float32)
    wproj = std * jax.random.normal(ks[3], (C, C), jnp.float32)
    bproj = std * jax.random.normal(ks[4], (1, C), jnp.float32)
    g1 = jnp.ones((1, C), jnp.float32)
    be1 = jnp.zeros((1, C), jnp.float32)
    g2 = jnp.ones((1, C), jnp.float32)
    be2 = jnp.zeros((1, C), jnp.float32)
    w1 = std * jax.random.normal(ks[5], (C, 4 * C), jnp.float32)
    bf1 = std * jax.random.normal(ks[6], (1, 4 * C), jnp.float32)
    w2 = std * jax.random.normal(ks[7], (4 * C, C), jnp.float32)
    bf2 = jnp.zeros((1, C), jnp.float32)
    return (wq, wk, wv, wproj, bproj, g1, be1, g2, be2, w1, bf1, w2, bf2)


# ---- host-side (free) repacking of weights for the kernel -------------------
def pack_params(params):
    (wq, wk, wv, wproj, bproj, g1, be1, g2, be2, w1, bf1, w2, bf2) = params
    C = wq.shape[0]
    FC = 4 * C

    wqkv = jnp.concatenate([wq, wk, wv], axis=1)       # (C, 3C): one dense matmul weight

    vecs = jnp.zeros((8, FC), jnp.float32)             # one f32 vreg worth of small params
    vecs = (vecs.at[0, :C].set(g1[0]).at[1, :C].set(be1[0])
                 .at[2, :C].set(g2[0]).at[3, :C].set(be2[0])
                 .at[4, :C].set(bproj[0]).at[5, :C].set(bf2[0])
                 .at[6, :].set(bf1[0]))
    return (wqkv, wproj, w1, w2, vecs)


# ---- pure-JAX reference (mirrors the PyTorch forward) ------------------------
def reference_block(x, params):
    (wq, wk, wv, wproj, bproj, g1, be1, g2, be2, w1, bf1, w2, bf2) = params
    B, T, C = x.shape

    def ln(v, g, b):
        mu = jnp.mean(v, axis=-1, keepdims=True)
        var = jnp.mean((v - mu) ** 2, axis=-1, keepdims=True)
        return (v - mu) * jax.lax.rsqrt(var + LN_EPS) * g + b

    xn = ln(x, g1[0], be1[0])
    q = xn @ wq; k = xn @ wk; v = xn @ wv
    hs = C // N_HEAD
    mask = jnp.tril(jnp.ones((T, T), bool))
    outs = []
    for h in range(N_HEAD):
        qh, kh, vh = (a[..., h * hs:(h + 1) * hs] for a in (q, k, v))
        wei = jnp.einsum("btd,bsd->bts", qh, kh) * C ** (-0.5)
        wei = jnp.where(mask, wei, -jnp.inf)
        wei = jax.nn.softmax(wei, axis=-1)
        outs.append(jnp.einsum("bts,bsd->btd", wei, vh))
    attn = jnp.concatenate(outs, axis=-1)
    x1 = x + (attn @ wproj + bproj[0])
    x2n = ln(x1, g2[0], be2[0])
    ff = jnp.maximum(x2n @ w1 + bf1[0], 0.0) @ w2 + bf2[0]
    return x1 + ff


if __name__ == "__main__":
    key = jax.random.PRNGKey(0)
    kx, kp = jax.random.split(key)
    B, T, C = 2, BLOCK_SIZE, N_EMBD
    x = jax.random.normal(kx, (B, T, C), jnp.float32)
    params = init_params(kp, C)
    packed = pack_params(params)

    out = transformer_block(x, packed)
    out = jax.block_until_ready(out)

    ref = reference_block(x, params)
    assert out.shape == (B, T, C)
    max_err = float(jnp.max(jnp.abs(out - ref)))
    # Softmax divide is now exact; tolerance kept conservative only for MXU f32
    # matmul default-precision differences vs the XLA reference.
    assert jnp.allclose(out, ref, atol=1e-3, rtol=1e-3), f"mismatch vs reference (max err {max_err})"
    print("KERNEL_OK")
</pallas_src>

<mosaic_0001>
module attributes {stable_mosaic.version = 11 : i64} {
  func.func @block_kernel(%arg0: i32, %arg1: memref<16x32xf32, #tpu.memory_space<vmem>>, %arg2: memref<32x96xf32, #tpu.memory_space<vmem>>, %arg3: memref<32x32xf32, #tpu.memory_space<vmem>>, %arg4: memref<32x128xf32, #tpu.memory_space<vmem>>, %arg5: memref<128x32xf32, #tpu.memory_space<vmem>>, %arg6: memref<8x128xf32, #tpu.memory_space<vmem>>, %arg7: memref<16x32xf32, #tpu.memory_space<vmem>>) attributes {dimension_semantics = [#tpu.dimension_semantics<arbitrary>], iteration_bounds = array<i64: 1>, scalar_prefetch = 0 : i64, scratch_operands = 0 : i64, tpu.core_type = #tpu.core_type<tc>, window_params = [{pipeline_mode = #tpu.pipeline_mode<synchronous>, transform_indices = @transform_0, window_bounds = array<i64: 16, 32>}, {pipeline_mode = #tpu.pipeline_mode<synchronous>, transform_indices = @transform_1, window_bounds = array<i64: 32, 96>}, {pipeline_mode = #tpu.pipeline_mode<synchronous>, transform_indices = @transform_2, window_bounds = array<i64: 32, 32>}, {pipeline_mode = #tpu.pipeline_mode<synchronous>, transform_indices = @transform_3, window_bounds = array<i64: 32, 128>}, {pipeline_mode = #tpu.pipeline_mode<synchronous>, transform_indices = @transform_4, window_bounds = array<i64: 128, 32>}, {pipeline_mode = #tpu.pipeline_mode<synchronous>, transform_indices = @transform_5, window_bounds = array<i64: 8, 128>}, {pipeline_mode = #tpu.pipeline_mode<synchronous>, transform_indices = @transform_6, window_bounds = array<i64: 16, 32>}]} {
    %c0 = arith.constant 0 : index
    %c0_0 = arith.constant 0 : index
    %0 = vector.load %arg1[%c0, %c0_0] : memref<16x32xf32, #tpu.memory_space<vmem>>, vector<16x32xf32>
    %c0_1 = arith.constant 0 : index
    %c0_2 = arith.constant 0 : index
    %1 = vector.load %arg6[%c0_1, %c0_2] : memref<8x128xf32, #tpu.memory_space<vmem>>, vector<8x128xf32>
    %2 = vector.extract_strided_slice %1 {offsets = [0, 0], sizes = [1, 32], strides = [1, 1]} : vector<8x128xf32> to vector<1x32xf32>
    %3 = vector.extract_strided_slice %1 {offsets = [1, 0], sizes = [1, 32], strides = [1, 1]} : vector<8x128xf32> to vector<1x32xf32>
    %4 = vector.extract_strided_slice %1 {offsets = [2, 0], sizes = [1, 32], strides = [1, 1]} : vector<8x128xf32> to vector<1x32xf32>
    %5 = vector.extract_strided_slice %1 {offsets = [3, 0], sizes = [1, 32], strides = [1, 1]} : vector<8x128xf32> to vector<1x32xf32>
    %6 = vector.extract_strided_slice %1 {offsets = [4, 0], sizes = [1, 32], strides = [1, 1]} : vector<8x128xf32> to vector<1x32xf32>
    %7 = vector.extract_strided_slice %1 {offsets = [5, 0], sizes = [1, 32], strides = [1, 1]} : vector<8x128xf32> to vector<1x32xf32>
    %8 = vector.extract_strided_slice %1 {offsets = [6, 0], sizes = [1, 128], strides = [1, 1]} : vector<8x128xf32> to vector<1x128xf32>
    %cst = arith.constant dense<0.000000e+00> : vector<16xf32>
    %9 = vector.multi_reduction <add>, %0, %cst [1] : vector<16x32xf32> to vector<16xf32>
    %10 = vector.shape_cast %9 : vector<16xf32> to vector<16x1xf32>
    %cst_3 = arith.constant 3.200000e+01 : f32
    %11 = vector.broadcast %cst_3 : f32 to vector<16x1xf32>
    %12 = arith.divf %10, %11 : vector<16x1xf32>
    %13 = vector.broadcast %12 : vector<16x1xf32> to vector<16x32xf32>
    %14 = arith.subf %0, %13 : vector<16x32xf32>
    %15 = arith.mulf %14, %14 : vector<16x32xf32>
    %cst_4 = arith.constant dense<0.000000e+00> : vector<16xf32>
    %16 = vector.multi_reduction <add>, %15, %cst_4 [1] : vector<16x32xf32> to vector<16xf32>
    %17 = vector.shape_cast %16 : vector<16xf32> to vector<16x1xf32>
    %cst_5 = arith.constant 3.200000e+01 : f32
    %18 = vector.broadcast %cst_5 : f32 to vector<16x1xf32>
    %19 = arith.divf %17, %18 : vector<16x1xf32>
    %20 = vector.broadcast %12 : vector<16x1xf32> to vector<16x32xf32>
    %21 = arith.subf %0, %20 : vector<16x32xf32>
    %cst_6 = arith.constant 9.99999974E-6 : f32
    %22 = vector.broadcast %cst_6 : f32 to vector<16x1xf32>
    %23 = arith.addf %19, %22 : vector<16x1xf32>
    %24 = math.rsqrt %23 : vector<16x1xf32>
    %25 = vector.broadcast %24 : vector<16x1xf32> to vector<16x32xf32>
    %26 = arith.mulf %21, %25 : vector<16x32xf32>
    %27 = vector.broadcast %2 : vector<1x32xf32> to vector<16x32xf32>
    %28 = arith.mulf %26, %27 : vector<16x32xf32>
    %29 = vector.broadcast %3 : vector<1x32xf32> to vector<16x32xf32>
    %30 = arith.addf %28, %29 : vector<16x32xf32>
    %c0_7 = arith.constant 0 : index
    %c0_8 = arith.constant 0 : index
    %31 = vector.load %arg2[%c0_7, %c0_8] : memref<32x96xf32, #tpu.memory_space<vmem>>, vector<32x96xf32>
    %cst_9 = arith.constant dense<0.000000e+00> : vector<16x96xf32>
    %32 = tpu.matmul %30, %31, %cst_9 {dimension_numbers = #tpu.dot_dimension_numbers<[1], [0], [0], [1], [0, 0, 1, 1], [], []>} : vector<16x32xf32>, vector<32x96xf32>, vector<16x96xf32> -> vector<16x96xf32>
    %33 = tpu.iota {dimensions = array<i32: 0>} : vector<8x8xi32>
    %34 = tpu.iota {dimensions = array<i32: 1>} : vector<8x8xi32>
    %35 = arith.cmpi sle, %34, %33 : vector<8x8xi32>
    %36 = vector.shape_cast %35 : vector<8x8xi1> to vector<1x8x8xi1>
    %37 = vector.extract_strided_slice %32 {offsets = [0, 0], sizes = [16, 8], strides = [1, 1]} : vector<16x96xf32> to vector<16x8xf32>
    %38 = vector.shape_cast %37 : vector<16x8xf32> to vector<2x8x8xf32>
    %39 = vector.extract_strided_slice %32 {offsets = [0, 32], sizes = [16, 8], strides = [1, 1]} : vector<16x96xf32> to vector<16x8xf32>
    %40 = vector.shape_cast %39 : vector<16x8xf32> to vector<2x8x8xf32>
    %41 = vector.extract_strided_slice %32 {offsets = [0, 64], sizes = [16, 8], strides = [1, 1]} : vector<16x96xf32> to vector<16x8xf32>
    %42 = vector.shape_cast %41 : vector<16x8xf32> to vector<2x8x8xf32>
    "tpu.trace_start"() <{level = 10 : i32, message = "btd,bsd->bts"}> : () -> ()
    %cst_10 = arith.constant dense<0.000000e+00> : vector<2x8x8xf32>
    %43 = tpu.matmul %38, %40, %cst_10 {dimension_numbers = #tpu.dot_dimension_numbers<[2], [2], [1], [1], [0, 0, 0, 1, 1, 1], [0], [0]>} : vector<2x8x8xf32>, vector<2x8x8xf32>, vector<2x8x8xf32> -> vector<2x8x8xf32>
    "tpu.trace_stop"() : () -> ()
    %cst_11 = arith.constant 0.176776692 : f32
    %44 = vector.broadcast %cst_11 : f32 to vector<2x8x8xf32>
    %45 = arith.mulf %43, %44 : vector<2x8x8xf32>
    %cst_12 = arith.constant 0xFF800000 : f32
    %46 = vector.shape_cast %36 : vector<1x8x8xi1> to vector<1x8x8xi1>
    %47 = vector.broadcast %46 : vector<1x8x8xi1> to vector<2x8x8xi1>
    %48 = vector.broadcast %cst_12 : f32 to vector<2x8x8xf32>
    %49 = arith.select %47, %45, %48 : vector<2x8x8xi1>, vector<2x8x8xf32>
    %cst_13 = arith.constant dense<0xFF800000> : vector<2x8xf32>
    %50 = vector.multi_reduction <maximumf>, %49, %cst_13 [2] : vector<2x8x8xf32> to vector<2x8xf32>
    %51 = vector.shape_cast %50 : vector<2x8xf32> to vector<2x8x1xf32>
    %52 = vector.broadcast %51 : vector<2x8x1xf32> to vector<2x8x8xf32>
    %53 = arith.subf %49, %52 : vector<2x8x8xf32>
    %54 = math.exp %53 : vector<2x8x8xf32>
    %cst_14 = arith.constant dense<0.000000e+00> : vector<2x8xf32>
    %55 = vector.multi_reduction <add>, %54, %cst_14 [2] : vector<2x8x8xf32> to vector<2x8xf32>
    %56 = vector.shape_cast %55 : vector<2x8xf32> to vector<2x8x1xf32>
    %57 = vector.broadcast %56 : vector<2x8x1xf32> to vector<2x8x8xf32>
    %58 = arith.divf %54, %57 : vector<2x8x8xf32>
    "tpu.trace_start"() <{level = 10 : i32, message = "bts,bsd->btd"}> : () -> ()
    %cst_15 = arith.constant dense<0.000000e+00> : vector<2x8x8xf32>
    %59 = tpu.matmul %58, %42, %cst_15 {dimension_numbers = #tpu.dot_dimension_numbers<[2], [1], [1], [2], [0, 0, 0, 1, 1, 2], [0], [0]>} : vector<2x8x8xf32>, vector<2x8x8xf32>, vector<2x8x8xf32> -> vector<2x8x8xf32>
    "tpu.trace_stop"() : () -> ()
    %60 = vector.extract_strided_slice %32 {offsets = [0, 8], sizes = [16, 8], strides = [1, 1]} : vector<16x96xf32> to vector<16x8xf32>
    %61 = vector.shape_cast %60 : vector<16x8xf32> to vector<2x8x8xf32>
    %62 = vector.extract_strided_slice %32 {offsets = [0, 40], sizes = [16, 8], strides = [1, 1]} : vector<16x96xf32> to vector<16x8xf32>
    %63 = vector.shape_cast %62 : vector<16x8xf32> to vector<2x8x8xf32>
    %64 = vector.extract_strided_slice %32 {offsets = [0, 72], sizes = [16, 8], strides = [1, 1]} : vector<16x96xf32> to vector<16x8xf32>
    %65 = vector.shape_cast %64 : vector<16x8xf32> to vector<2x8x8xf32>
    "tpu.trace_start"() <{level = 10 : i32, message = "btd,bsd->bts"}> : () -> ()
    %cst_16 = arith.constant dense<0.000000e+00> : vector<2x8x8xf32>
    %66 = tpu.matmul %61, %63, %cst_16 {dimension_numbers = #tpu.dot_dimension_numbers<[2], [2], [1], [1], [0, 0, 0, 1, 1, 1], [0], [0]>} : vector<2x8x8xf32>, vector<2x8x8xf32>, vector<2x8x8xf32> -> vector<2x8x8xf32>
    "tpu.trace_stop"() : () -> ()
    %cst_17 = arith.constant 0.176776692 : f32
    %67 = vector.broadcast %cst_17 : f32 to vector<2x8x8xf32>
    %68 = arith.mulf %66, %67 : vector<2x8x8xf32>
    %cst_18 = arith.constant 0xFF800000 : f32
    %69 = vector.shape_cast %36 : vector<1x8x8xi1> to vector<1x8x8xi1>
    %70 = vector.broadcast %69 : vector<1x8x8xi1> to vector<2x8x8xi1>
    %71 = vector.broadcast %cst_18 : f32 to vector<2x8x8xf32>
    %72 = arith.select %70, %68, %71 : vector<2x8x8xi1>, vector<2x8x8xf32>
    %cst_19 = arith.constant dense<0xFF800000> : vector<2x8xf32>
    %73 = vector.multi_reduction <maximumf>, %72, %cst_19 [2] : vector<2x8x8xf32> to vector<2x8xf32>
    %74 = vector.shape_cast %73 : vector<2x8xf32> to vector<2x8x1xf32>
    %75 = vector.broadcast %74 : vector<2x8x1xf32> to vector<2x8x8xf32>
    %76 = arith.subf %72, %75 : vector<2x8x8xf32>
    %77 = math.exp %76 : vector<2x8x8xf32>
    %cst_20 = arith.constant dense<0.000000e+00> : vector<2x8xf32>
    %78 = vector.multi_reduction <add>, %77, %cst_20 [2] : vector<2x8x8xf32> to vector<2x8xf32>
    %79 = vector.shape_cast %78 : vector<2x8xf32> to vector<2x8x1xf32>
    %80 = vector.broadcast %79 : vector<2x8x1xf32> to vector<2x8x8xf32>
    %81 = arith.divf %77, %80 : vector<2x8x8xf32>
    "tpu.trace_start"() <{level = 10 : i32, message = "bts,bsd->btd"}> : () -> ()
    %cst_21 = arith.constant dense<0.000000e+00> : vector<2x8x8xf32>
    %82 = tpu.matmul %81, %65, %cst_21 {dimension_numbers = #tpu.dot_dimension_numbers<[2], [1], [1], [2], [0, 0, 0, 1, 1, 2], [0], [0]>} : vector<2x8x8xf32>, vector<2x8x8xf32>, vector<2x8x8xf32> -> vector<2x8x8xf32>
    "tpu.trace_stop"() : () -> ()
    %83 = vector.extract_strided_slice %32 {offsets = [0, 16], sizes = [16, 8], strides = [1, 1]} : vector<16x96xf32> to vector<16x8xf32>
    %84 = vector.shape_cast %83 : vector<16x8xf32> to vector<2x8x8xf32>
    %85 = vector.extract_strided_slice %32 {offsets = [0, 48], sizes = [16, 8], strides = [1, 1]} : vector<16x96xf32> to vector<16x8xf32>
    %86 = vector.shape_cast %85 : vector<16x8xf32> to vector<2x8x8xf32>
    %87 = vector.extract_strided_slice %32 {offsets = [0, 80], sizes = [16, 8], strides = [1, 1]} : vector<16x96xf32> to vector<16x8xf32>
    %88 = vector.shape_cast %87 : vector<16x8xf32> to vector<2x8x8xf32>
    "tpu.trace_start"() <{level = 10 : i32, message = "btd,bsd->bts"}> : () -> ()
    %cst_22 = arith.constant dense<0.000000e+00> : vector<2x8x8xf32>
    %89 = tpu.matmul %84, %86, %cst_22 {dimension_numbers = #tpu.dot_dimension_numbers<[2], [2], [1], [1], [0, 0, 0, 1, 1, 1], [0], [0]>} : vector<2x8x8xf32>, vector<2x8x8xf32>, vector<2x8x8xf32> -> vector<2x8x8xf32>
    "tpu.trace_stop"() : () -> ()
    %cst_23 = arith.constant 0.176776692 : f32
    %90 = vector.broadcast %cst_23 : f32 to vector<2x8x8xf32>
    %91 = arith.mulf %89, %90 : vector<2x8x8xf32>
    %cst_24 = arith.constant 0xFF800000 : f32
    %92 = vector.shape_cast %36 : vector<1x8x8xi1> to vector<1x8x8xi1>
    %93 = vector.broadcast %92 : vector<1x8x8xi1> to vector<2x8x8xi1>
    %94 = vector.broadcast %cst_24 : f32 to vector<2x8x8xf32>
    %95 = arith.select %93, %91, %94 : vector<2x8x8xi1>, vector<2x8x8xf32>
    %cst_25 = arith.constant dense<0xFF800000> : vector<2x8xf32>
    %96 = vector.multi_reduction <maximumf>, %95, %cst_25 [2] : vector<2x8x8xf32> to vector<2x8xf32>
    %97 = vector.shape_cast %96 : vector<2x8xf32> to vector<2x8x1xf32>
    %98 = vector.broadcast %97 : vector<2x8x1xf32> to vector<2x8x8xf32>
    %99 = arith.subf %95, %98 : vector<2x8x8xf32>
    %100 = math.exp %99 : vector<2x8x8xf32>
    %cst_26 = arith.constant dense<0.000000e+00> : vector<2x8xf32>
    %101 = vector.multi_reduction <add>, %100, %cst_26 [2] : vector<2x8x8xf32> to vector<2x8xf32>
    %102 = vector.shape_cast %101 : vector<2x8xf32> to vector<2x8x1xf32>
    %103 = vector.broadcast %102 : vector<2x8x1xf32> to vector<2x8x8xf32>
    %104 = arith.divf %100, %103 : vector<2x8x8xf32>
    "tpu.trace_start"() <{level = 10 : i32, message = "bts,bsd->btd"}> : () -> ()
    %cst_27 = arith.constant dense<0.000000e+00> : vector<2x8x8xf32>
    %105 = tpu.matmul %104, %88, %cst_27 {dimension_numbers = #tpu.dot_dimension_numbers<[2], [1], [1], [2], [0, 0, 0, 1, 1, 2], [0], [0]>} : vector<2x8x8xf32>, vector<2x8x8xf32>, vector<2x8x8xf32> -> vector<2x8x8xf32>
    "tpu.trace_stop"() : () -> ()
    %106 = vector.extract_strided_slice %32 {offsets = [0, 24], sizes = [16, 8], strides = [1, 1]} : vector<16x96xf32> to vector<16x8xf32>
    %107 = vector.shape_cast %106 : vector<16x8xf32> to vector<2x8x8xf32>
    %108 = vector.extract_strided_slice %32 {offsets = [0, 56], sizes = [16, 8], strides = [1, 1]} : vector<16x96xf32> to vector<16x8xf32>
    %109 = vector.shape_cast %108 : vector<16x8xf32> to vector<2x8x8xf32>
    %110 = vector.extract_strided_slice %32 {offsets = [0, 88], sizes = [16, 8], strides = [1, 1]} : vector<16x96xf32> to vector<16x8xf32>
    %111 = vector.shape_cast %110 : vector<16x8xf32> to vector<2x8x8xf32>
    "tpu.trace_start"() <{level = 10 : i32, message = "btd,bsd->bts"}> : () -> ()
    %cst_28 = arith.constant dense<0.000000e+00> : vector<2x8x8xf32>
    %112 = tpu.matmul %107, %109, %cst_28 {dimension_numbers = #tpu.dot_dimension_numbers<[2], [2], [1], [1], [0, 0, 0, 1, 1, 1], [0], [0]>} : vector<2x8x8xf32>, vector<2x8x8xf32>, vector<2x8x8xf32> -> vector<2x8x8xf32>
    "tpu.trace_stop"() : () -> ()
    %cst_29 = arith.constant 0.176776692 : f32
    %113 = vector.broadcast %cst_29 : f32 to vector<2x8x8xf32>
    %114 = arith.mulf %112, %113 : vector<2x8x8xf32>
    %cst_30 = arith.constant 0xFF800000 : f32
    %115 = vector.shape_cast %36 : vector<1x8x8xi1> to vector<1x8x8xi1>
    %116 = vector.broadcast %115 : vector<1x8x8xi1> to vector<2x8x8xi1>
    %117 = vector.broadcast %cst_30 : f32 to vector<2x8x8xf32>
    %118 = arith.select %116, %114, %117 : vector<2x8x8xi1>, vector<2x8x8xf32>
    %cst_31 = arith.constant dense<0xFF800000> : vector<2x8xf32>
    %119 = vector.multi_reduction <maximumf>, %118, %cst_31 [2] : vector<2x8x8xf32> to vector<2x8xf32>
    %120 = vector.shape_cast %119 : vector<2x8xf32> to vector<2x8x1xf32>
    %121 = vector.broadcast %120 : vector<2x8x1xf32> to vector<2x8x8xf32>
    %122 = arith.subf %118, %121 : vector<2x8x8xf32>
    %123 = math.exp %122 : vector<2x8x8xf32>
    %cst_32 = arith.constant dense<0.000000e+00> : vector<2x8xf32>
    %124 = vector.multi_reduction <add>, %123, %cst_32 [2] : vector<2x8x8xf32> to vector<2x8xf32>
    %125 = vector.shape_cast %124 : vector<2x8xf32> to vector<2x8x1xf32>
    %126 = vector.broadcast %125 : vector<2x8x1xf32> to vector<2x8x8xf32>
    %127 = arith.divf %123, %126 : vector<2x8x8xf32>
    "tpu.trace_start"() <{level = 10 : i32, message = "bts,bsd->btd"}> : () -> ()
    %cst_33 = arith.constant dense<0.000000e+00> : vector<2x8x8xf32>
    %128 = tpu.matmul %127, %111, %cst_33 {dimension_numbers = #tpu.dot_dimension_numbers<[2], [1], [1], [2], [0, 0, 0, 1, 1, 2], [0], [0]>} : vector<2x8x8xf32>, vector<2x8x8xf32>, vector<2x8x8xf32> -> vector<2x8x8xf32>
    "tpu.trace_stop"() : () -> ()
    %129 = tpu.concatenate %59, %82, %105, %128 in 2 : vector<2x8x8xf32>, vector<2x8x8xf32>, vector<2x8x8xf32>, vector<2x8x8xf32> -> vector<2x8x32xf32>
    %130 = vector.shape_cast %129 : vector<2x8x32xf32> to vector<16x32xf32>
    %c0_34 = arith.constant 0 : index
    %c0_35 = arith.constant 0 : index
    %131 = vector.load %arg3[%c0_34, %c0_35] : memref<32x32xf32, #tpu.memory_space<vmem>>, vector<32x32xf32>
    %cst_36 = arith.constant dense<0.000000e+00> : vector<16x32xf32>
    %132 = tpu.matmul %130, %131, %cst_36 {dimension_numbers = #tpu.dot_dimension_numbers<[1], [0], [0], [1], [0, 0, 1, 1], [], []>} : vector<16x32xf32>, vector<32x32xf32>, vector<16x32xf32> -> vector<16x32xf32>
    %133 = vector.broadcast %6 : vector<1x32xf32> to vector<16x32xf32>
    %134 = arith.addf %132, %133 : vector<16x32xf32>
    %135 = arith.addf %0, %134 : vector<16x32xf32>
    %cst_37 = arith.constant dense<0.000000e+00> : vector<16xf32>
    %136 = vector.multi_reduction <add>, %135, %cst_37 [1] : vector<16x32xf32> to vector<16xf32>
    %137 = vector.shape_cast %136 : vector<16xf32> to vector<16x1xf32>
    %cst_38 = arith.constant 3.200000e+01 : f32
    %138 = vector.broadcast %cst_38 : f32 to vector<16x1xf32>
    %139 = arith.divf %137, %138 : vector<16x1xf32>
    %140 = vector.broadcast %139 : vector<16x1xf32> to vector<16x32xf32>
    %141 = arith.subf %135, %140 : vector<16x32xf32>
    %142 = arith.mulf %141, %141 : vector<16x32xf32>
    %cst_39 = arith.constant dense<0.000000e+00> : vector<16xf32>
    %143 = vector.multi_reduction <add>, %142, %cst_39 [1] : vector<16x32xf32> to vector<16xf32>
    %144 = vector.shape_cast %143 : vector<16xf32> to vector<16x1xf32>
    %cst_40 = arith.constant 3.200000e+01 : f32
    %145 = vector.broadcast %cst_40 : f32 to vector<16x1xf32>
    %146 = arith.divf %144, %145 : vector<16x1xf32>
    %147 = vector.broadcast %139 : vector<16x1xf32> to vector<16x32xf32>
    %148 = arith.subf %135, %147 : vector<16x32xf32>
    %cst_41 = arith.constant 9.99999974E-6 : f32
    %149 = vector.broadcast %cst_41 : f32 to vector<16x1xf32>
    %150 = arith.addf %146, %149 : vector<16x1xf32>
    %151 = math.rsqrt %150 : vector<16x1xf32>
    %152 = vector.broadcast %151 : vector<16x1xf32> to vector<16x32xf32>
    %153 = arith.mulf %148, %152 : vector<16x32xf32>
    %154 = vector.broadcast %4 : vector<1x32xf32> to vector<16x32xf32>
    %155 = arith.mulf %153, %154 : vector<16x32xf32>
    %156 = vector.broadcast %5 : vector<1x32xf32> to vector<16x32xf32>
    %157 = arith.addf %155, %156 : vector<16x32xf32>
    %c0_42 = arith.constant 0 : index
    %c0_43 = arith.constant 0 : index
    %158 = vector.load %arg4[%c0_42, %c0_43] : memref<32x128xf32, #tpu.memory_space<vmem>>, vector<32x128xf32>
    %cst_44 = arith.constant dense<0.000000e+00> : vector<16x128xf32>
    %159 = tpu.matmul %157, %158, %cst_44 {dimension_numbers = #tpu.dot_dimension_numbers<[1], [0], [0], [1], [0, 0, 1, 1], [], []>} : vector<16x32xf32>, vector<32x128xf32>, vector<16x128xf32> -> vector<16x128xf32>
    %160 = vector.broadcast %8 : vector<1x128xf32> to vector<16x128xf32>
    %161 = arith.addf %159, %160 : vector<16x128xf32>
    %cst_45 = arith.constant 0.000000e+00 : f32
    %162 = vector.broadcast %cst_45 : f32 to vector<16x128xf32>
    %163 = arith.maximumf %161, %162 : vector<16x128xf32>
    %c0_46 = arith.constant 0 : index
    %c0_47 = arith.constant 0 : index
    %164 = vector.load %arg5[%c0_46, %c0_47] : memref<128x32xf32, #tpu.memory_space<vmem>>, vector<128x32xf32>
    %cst_48 = arith.constant dense<0.000000e+00> : vector<16x32xf32>
    %165 = tpu.matmul %163, %164, %cst_48 {dimension_numbers = #tpu.dot_dimension_numbers<[1], [0], [0], [1], [0, 0, 1, 1], [], []>} : vector<16x128xf32>, vector<128x32xf32>, vector<16x32xf32> -> vector<16x32xf32>
    %166 = vector.broadcast %7 : vector<1x32xf32> to vector<16x32xf32>
    %167 = arith.addf %165, %166 : vector<16x32xf32>
    %168 = arith.addf %135, %167 : vector<16x32xf32>
    %c0_49 = arith.constant 0 : index
    %c0_50 = arith.constant 0 : index
    %169 = vector.load %arg7[%c0_49, %c0_50] : memref<16x32xf32, #tpu.memory_space<vmem>>, vector<16x32xf32>
    tpu.vector_store %arg7[%c0_49, %c0_50], %168 {strides = array<i32>} : memref<16x32xf32, #tpu.memory_space<vmem>>, vector<16x32xf32>,
    return
  }
  func.func @transform_0(%arg0: i32) -> (i32, i32) {
    %c0_i32 = arith.constant 0 : i32
    %c0_i32_0 = arith.constant 0 : i32
    %c0_i32_1 = arith.constant 0 : i32
    return %c0_i32, %c0_i32_0 : i32, i32
  }
  func.func @transform_1(%arg0: i32) -> (i32, i32) {
    %c0_i32 = arith.constant 0 : i32
    %c0_i32_0 = arith.constant 0 : i32
    %c0_i32_1 = arith.constant 0 : i32
    return %c0_i32, %c0_i32_0 : i32, i32
  }
  func.func @transform_2(%arg0: i32) -> (i32, i32) {
    %c0_i32 = arith.constant 0 : i32
    %c0_i32_0 = arith.constant 0 : i32
    %c0_i32_1 = arith.constant 0 : i32
    return %c0_i32, %c0_i32_0 : i32, i32
  }
  func.func @transform_3(%arg0: i32) -> (i32, i32) {
    %c0_i32 = arith.constant 0 : i32
    %c0_i32_0 = arith.constant 0 : i32
    %c0_i32_1 = arith.constant 0 : i32
    return %c0_i32, %c0_i32_0 : i32, i32
  }
  func.func @transform_4(%arg0: i32) -> (i32, i32) {
    %c0_i32 = arith.constant 0 : i32
    %c0_i32_0 = arith.constant 0 : i32
    %c0_i32_1 = arith.constant 0 : i32
    return %c0_i32, %c0_i32_0 : i32, i32
  }
  func.func @transform_5(%arg0: i32) -> (i32, i32) {
    %c0_i32 = arith.constant 0 : i32
    %c0_i32_0 = arith.constant 0 : i32
    %c0_i32_1 = arith.constant 0 : i32
    return %c0_i32, %c0_i32_0 : i32, i32
  }
  func.func @transform_6(%arg0: i32) -> (i32, i32) {
    %c0_i32 = arith.constant 0 : i32
    %c0_i32_0 = arith.constant 0 : i32
    %c0_i32_1 = arith.constant 0 : i32
    return %c0_i32, %c0_i32_0 : i32, i32
  }
}

</mosaic_0001>

<bundles_post_ra>
// kernel: tpu_custom_call.1
= control target key start
LH: loop header
LB: loop body
LE: loop exit
PB: predicated region body
PF: predicated region fallthrough
CT: control target
= control target key end

     0   :  { %vm27_vm0 = vcmask 261120   ;;  %s1456_s0 = inlined_call_operand.vmem [shape: f32[16,32], index: 0, kind: input, shape index: {}]   ;;  %s1457_s1 = inlined_call_operand.vmem [shape: f32[32,96], index: 1, kind: input, shape index: {}]   ;;  %s1458_s2 = inlined_call_operand.vmem [shape: f32[32,32], index: 2, kind: input, shape index: {}]   ;;  %s1459_s3 = inlined_call_operand.vmem [shape: f32[32,128], index: 3, kind: input, shape index: {}]   ;;  %s1460_s4 = inlined_call_operand.vmem [shape: f32[128,32], index: 4, kind: input, shape index: {}]   ;;  %s1461_s5 = inlined_call_operand.vmem [shape: f32[8,128], index: 5, kind: input, shape index: {}]   ;;  %s1462_s6 = inlined_call_operand.hbm [shape: f32[16,32], index: 6, kind: output, shape index: {}]  }
   0x1   :  { %v1150_v0 = vld [vmem:[%s1456_s0] sm:$0xff] }
   0x2   :  { %11 = vsyncpa [#allocation3], 0  ;;  %v28_v1 = vsel %vm27_vm0, %v1150_v0, 0.0  ;;  %v1157_v2 = vld [vmem:[%s1456_s0 + $0x8] sm:$0xff]  ;;  %v1095_v4 = vmov 32.0   ;;  %v88_v21 = vld [vmem:[%s1457_s1 + $0x18] sm:$0xff]  ;;  %v118_v58 = vlaneseq }
   0x3   :  { %29 = vadd.xlane.f32.xlu0 %v28_v1  ;;  %v31_v3 = vsel %vm27_vm0, %v1157_v2, 0.0  ;;  %1027 = vrcp.f32 %v1095_v4  ;;  %107 = vmatpush.msra.mxu0 %v88_v21  ;;  %v87_v22 = vld [vmem:[%s1457_s1 + $0x10] sm:$0xff]  ;;  %v86_v23 = vld [vmem:[%s1457_s1 + $0x8] sm:$0xff]  ;;  %v85_v24 = vld [vmem:[%s1457_s1] sm:$0xff]  ;;  %s1096_s1 = smov 96   ;;  %vm126_vm8 = vcmask 64512  }
   0x4   :  { %v1186_v36 = vld [vmem:[%s1461_s5] sm:$0xff]  ;;  %v119_v59 = vshrl.u32 %v118_v58, 7  ;;  %v121_v60 = vand.u32 127, %v118_v58  ;;  %s1097_s5 = smov 64   ;;  %s1098_s10 = smov 88  }
   0x5   :  { %108 = vmatpush.msra.mxu0 %v87_v22  ;;  %v79_v40 = vperm.slane %v1186_v36, 0  ;;  %v82_v44 = vperm.slane %v1186_v36, 1  ;;  %s1099_s11 = smov 120   ;;  %s1100_s12 = smov 56  }
   0x6   :  { %vm1204_vm9 = vcmp.le.s32.totalorder %v121_v60, %v119_v59  ;;  %s1101_s13 = smov 80   ;;  %s1102_s14 = smov 112  }
   0x7   :  { %109 = vmatpush.msra.mxu0 %v86_v23  ;;  %s1103_s15 = smov 104   ;;  %s1104_s16 = smov 72  }
   0x8   :  { %s1105_s17 = smov 48   ;;  %s1106_s18 = smov 40  }
   0x9   :  { %v1028_v5 = vpop.eup %1027  ;;  %110 = vmatpush.msra.mxu0 %v85_v24  ;;  %s1107_s19 = smov 8   ;;  %s1108_s20 = smov 16  }
   0xa   :  { %v35_v6 = vmul.f32 32.0, %v1028_v5  ;;  %vm39_vm1 = vweird.f32 %v1028_v5  ;;  %s1109_s21 = smov 24  }
   0xb   :  { %32 = vadd.xlane.f32.xlu0 %v31_v3 }
   0xc   :  { %v36_v7 = vsub.f32 1.0, %v35_v6 }
   0xe   :  { %v37_v8 = vmul.f32 %v1028_v5, %v36_v7 }
  0x10   :  { %v38_v9 = vadd.f32 %v1028_v5, %v37_v8 }
  0x12   :  { %v1161_v10 = vsel %vm39_vm1, %v1028_v5, %v38_v9 }
  0x76   :  { %v30_v11 = vpop.xlane.xlu0 %29 }
  0x77   :  { %v41_v12 = vmul.f32 %v1161_v10, %v30_v11 }
  0x79   :  { %v43_v13 = vsub.f32 %v1150_v0, %v41_v12 }
  0x7b   :  { %v45_v14 = vmul.f32 %v43_v13, %v43_v13 }
  0x7d   :  { %v47_v15 = vsel %vm27_vm0, %v45_v14, 0.0 }
  0x7e   :  { %48 = vadd.xlane.f32.xlu1 %v47_v15  ;;  %v33_v16 = vpop.xlane.xlu0 %32 }
  0x7f   :  { %v42_v17 = vmul.f32 %v1161_v10, %v33_v16 }
  0x81   :  { %v44_v18 = vsub.f32 %v1157_v2, %v42_v17 }
  0x83   :  { %v46_v19 = vmul.f32 %v44_v18, %v44_v18 }
  0x85   :  { %v50_v20 = vsel %vm27_vm0, %v46_v19, 0.0 }
  0x86   :  { %51 = vadd.xlane.f32.xlu1 %v50_v20 }
  0xf1   :  { %v49_v25 = vpop.xlane.xlu1 %48 }
  0xf2   :  { %v53_v26 = vmul.f32 %v49_v25, %v1161_v10 }
  0xf4   :  { %v55_v27 = vadd.f32 1e-05, %v53_v26 }
  0xf6   :  { %1029 = vrsqrt.f32 %v55_v27  ;;  %vm63_vm3 = vweird.f32 %v55_v27 }
  0xf9   :  { %v52_v28 = vpop.xlane.xlu1 %51 }
  0xfa   :  { %v54_v29 = vmul.f32 %v52_v28, %v1161_v10 }
  0xfc   :  { %v1030_v30 = vpop.eup %1029  ;;  %v56_v31 = vadd.f32 1e-05, %v54_v29 }
  0xfd   :  { %v58_v32 = vmul.f32 %v1030_v30, %v55_v27  ;;  %vm64_vm2 = vweird.f32 %v1030_v30 }
  0xfe   :  { %1031 = vrsqrt.f32 %v56_v31  ;;  %vm65_vm4 = vmor %vm63_vm3, %vm64_vm2  ;;  %vm73_vm6 = vweird.f32 %v56_v31 }
  0xff   :  { %v59_v33 = vmul.f32 %v1030_v30, %v58_v32 }
 0x101   :  { %v60_v34 = vmul.f32 0.5, %v59_v33 }
 0x103   :  { %v61_v35 = vsub.f32 1.5, %v60_v34 }
 0x104   :  { %v1032_v37 = vpop.eup %1031 }
 0x105   :  { %v62_v38 = vmul.f32 %v1030_v30, %v61_v35  ;;  %v68_v39 = vmul.f32 %v1032_v37, %v56_v31  ;;  %vm74_vm5 = vweird.f32 %v1032_v37 }
 0x106   :  { %vm75_vm7 = vmor %vm73_vm6, %vm74_vm5 }
 0x107   :  { %v66_v41 = vsel %vm65_vm4, %v1030_v30, %v62_v38  ;;  %v69_v42 = vmul.f32 %v1032_v37, %v68_v39 }
 0x108   :  { %v77_v43 = vmul.f32 %v66_v41, %v43_v13 }
 0x109   :  { %v70_v45 = vmul.f32 0.5, %v69_v42 }
 0x10a   :  { %v80_v46 = vmul.f32 %v79_v40, %v77_v43 }
 0x10b   :  { %v71_v47 = vsub.f32 1.5, %v70_v45 }
 0x10c   :  { %v83_v48 = vadd.f32 %v82_v44, %v80_v46 }
 0x10d   :  { %v72_v49 = vmul.f32 %v1032_v37, %v71_v47 }
 0x10e   :  { %980 = vmatmul.msk.f32.vlgmr.msra.gmra.mxu0 %vm27_vm0, %v83_v48 }
 0x10f   :  { %v76_v50 = vsel %vm75_vm7, %v1032_v37, %v72_v49 }
 0x110   :  { %v78_v51 = vmul.f32 %v76_v50, %v44_v18 }
 0x112   :  { %v81_v52 = vmul.f32 %v79_v40, %v78_v51 }
 0x114   :  { %v84_v53 = vadd.f32 %v82_v44, %v81_v52 }
 0x116   :  { %981 = vmatmul.msk.f32.gmra.mxu0 %vm27_vm0, %v84_v53 }
 0x18b   :  { %v1192_v54 = vpop.f32.mrf.mxu0 }
 0x18c   :  { %124 = vrot.lane.b32.xlu2 %v1192_v54, %s1096_s1 }
 0x193   :  { %v1195_v55 = vpop.f32.mrf.mxu0 }
 0x194   :  { %152 = vrot.lane.b32.xlu2 %v1195_v55, %s1096_s1 }
 0x1e6   :  { %v125_v56 = vpop.permute.xlu2 %124 }
 0x1e7   :  { %982 = vmatpush.xpose.msk.msra.mxu1 %vm126_vm8, %v125_v56 }
 0x1ea   :  { %983 = vmatmul.msk.f32.vlgmr.msra.gmra.mxu1 %vm126_vm8, %v1192_v54 }
 0x1ee   :  { %v153_v57 = vpop.permute.xlu2 %152 }
 0x1ef   :  { %984 = vmatpush.xpose.msk.msra.mxu2 %vm126_vm8, %v153_v57 }
 0x1f2   :  { %985 = vmatmul.msk.f32.vlgmr.msra.gmra.mxu2 %vm126_vm8, %v1195_v55 }
 0x267   :  { %v148_v61 = vpop.f32.mrf.mxu1 }
 0x268   :  { %v178_v63 = vmul.f32 0.17677669, %v148_v61 }
 0x26a   :  { %v182_v1 = vsel %vm1204_vm9, %v178_v63, -inf }
 0x26b   :  { %v184_v3 = vsel %vm126_vm8, %v182_v1, -inf }
 0x26c   :  { %185 = vmax.xlane.f32.xlu0 %v184_v3 }
 0x275   :  { %v175_v4 = vpop.f32.mrf.mxu2 }
 0x276   :  { %v179_v5 = vmul.f32 0.17677669, %v175_v4 }
 0x278   :  { %v183_v6 = vsel %vm1204_vm9, %v179_v5, -inf }
 0x279   :  { %v187_v7 = vsel %vm126_vm8, %v183_v6, -inf }
 0x27a   :  { %188 = vmax.xlane.f32.xlu1 %v187_v7 }
 0x280   :  { %258 = vrot.lane.b32.xlu0 %v1195_v55, %s1097_s5 }
 0x293   :  { %232 = vrot.lane.b32.xlu1 %v1192_v54, %s1097_s5 }
 0x29b   :  { %286 = vrot.lane.b32.xlu1 %v1192_v54, %s1098_s10 }
 0x2df   :  { %v186_v8 = vpop.xlane.xlu0 %185 }
 0x2e0   :  { %v190_v9 = vsub.f32 %v182_v1, %v186_v8 }
 0x2e2   :  { %v192_v11 = vmul.f32 1.442695, %v190_v9 }
 0x2e4   :  { %1033 = vpow2.f32 %v192_v11 }
 0x2ea   :  { %v1034_v12 = vpop.eup %1033 }
 0x2eb   :  { %v196_v13 = vsel %vm126_vm8, %v1034_v12, 0.0 }
 0x2ec   :  { %197 = vadd.xlane.f32.xlu2 %v196_v13 }
 0x2ed   :  { %v189_v14 = vpop.xlane.xlu1 %188 }
 0x2ee   :  { %v191_v15 = vsub.f32 %v183_v6, %v189_v14 }
 0x2f0   :  { %v194_v16 = vmul.f32 1.442695, %v191_v15 }
 0x2f2   :  { %1035 = vpow2.f32 %v194_v16  ;;  %v259_v20 = vpop.permute.xlu0 %258 }
 0x2f8   :  { %v1036_v17 = vpop.eup %1035 }
 0x2f9   :  { %v199_v18 = vsel %vm126_vm8, %v1036_v17, 0.0 }
 0x2fa   :  { %200 = vadd.xlane.f32.xlu0 %v199_v18 }
 0x304   :  { %312 = vrot.lane.b32.xlu2 %v1195_v55, %s1099_s11 }
 0x305   :  { %v233_v19 = vpop.permute.xlu1 %232 }
 0x306   :  { %253 = vmatpush.msrb.mxu1 %v233_v19 }
 0x308   :  { %279 = vmatpush.msra.mxu1 %v259_v20 }
 0x30d   :  { %v287_v34 = vpop.permute.xlu1 %286 }
 0x30e   :  { %284 = vrot.lane.b32.xlu0 %v1192_v54, %s1099_s11 }
 0x316   :  { %314 = vrot.lane.b32.xlu0 %v1195_v55, %s1098_s10 }
 0x31e   :  { %392 = vrot.lane.b32.xlu0 %v1192_v54, %s1100_s12 }
 0x326   :  { %446 = vrot.lane.b32.xlu0 %v1192_v54, %s1101_s13 }
 0x32e   :  { %444 = vrot.lane.b32.xlu0 %v1192_v54, %s1102_s14 }
 0x336   :  { %604 = vrot.lane.b32.xlu0 %v1192_v54, %s1103_s15 }
 0x33e   :  { %634 = vrot.lane.b32.xlu0 %v1195_v55, %s1104_s16 }
 0x35f   :  { %v198_v21 = vpop.xlane.xlu2 %197 }
 0x360   :  { %1037 = vrcp.f32 %v198_v21  ;;  %v213_v25 = vand.u32 2147483648, %v198_v21  ;;  %v211_v27 = vand.u32 2147483647, %v198_v21  ;;  %vm207_vm11 = vweird.f32 %v198_v21 }
 0x362   :  { %v214_v30 = vor.u32 1.1754944e-38, %v213_v25  ;;  %vm212_vm13 = vcmp.eq.f32.partialorder %v211_v27, 8.507059e+37 }
 0x366   :  { %v1038_v22 = vpop.eup %1037 }
 0x367   :  { %v203_v23 = vmul.f32 %v1038_v22, %v198_v21  ;;  %vm208_vm10 = vweird.f32 %v1038_v22  ;;  %v313_v49 = vpop.permute.xlu2 %312 }
 0x368   :  { %vm209_vm12 = vmor %vm207_vm11, %vm208_vm10 }
 0x369   :  { %v204_v24 = vsub.f32 1.0, %v203_v23 }
 0x36b   :  { %v205_v26 = vmul.f32 %v1038_v22, %v204_v24 }
 0x36d   :  { %v206_v28 = vadd.f32 %v1038_v22, %v205_v26  ;;  %v201_v29 = vpop.xlane.xlu0 %200 }
 0x36e   :  { %1039 = vrcp.f32 %v201_v29  ;;  %v228_v39 = vand.u32 2147483648, %v201_v29  ;;  %v226_v41 = vand.u32 2147483647, %v201_v29  ;;  %vm222_vm15 = vweird.f32 %v201_v29 }
 0x36f   :  { %v210_v31 = vsel %vm209_vm12, %v1038_v22, %v206_v28 }
 0x370   :  { %v215_v32 = vsel %vm212_vm13, %v214_v30, %v210_v31  ;;  %v229_v43 = vor.u32 1.1754944e-38, %v228_v39  ;;  %vm227_vm2 = vcmp.eq.f32.partialorder %v226_v41, 8.507059e+37 }
 0x371   :  { %v216_v33 = vmul.f32 %v1034_v12, %v215_v32 }
 0x373   :  { %986 = vmatmul.msk.f32.vlgmr.msrb.gmra.mxu1 %vm126_vm8, %v216_v33 }
 0x374   :  { %v1040_v35 = vpop.eup %1039  ;;  %988 = vmatpush.xpose.msk.msrb.mxu1 %vm126_vm8, %v287_v34 }
 0x375   :  { %v218_v37 = vmul.f32 %v1040_v35, %v201_v29  ;;  %vm223_vm14 = vweird.f32 %v1040_v35 }
 0x376   :  { %vm224_vm1 = vmor %vm222_vm15, %vm223_vm14 }
 0x377   :  { %v219_v38 = vsub.f32 1.0, %v218_v37 }
 0x379   :  { %v220_v40 = vmul.f32 %v1040_v35, %v219_v38 }
 0x37b   :  { %v221_v42 = vadd.f32 %v1040_v35, %v220_v40 }
 0x37d   :  { %v225_v44 = vsel %vm224_vm1, %v1040_v35, %v221_v42 }
 0x37e   :  { %v230_v45 = vsel %vm227_vm2, %v229_v43, %v225_v44 }
 0x37f   :  { %v231_v46 = vmul.f32 %v1036_v17, %v230_v45 }
 0x380   :  { %v285_v47 = vpop.permute.xlu0 %284 }
 0x381   :  { %987 = vmatmul.msk.f32.vlgmr.msra.gmra.mxu1 %vm126_vm8, %v231_v46 }
 0x388   :  { %v315_v48 = vpop.permute.xlu0 %314 }
 0x389   :  { %989 = vmatmul.msk.f32.vlgmr.msrb.gmra.mxu1 %vm126_vm8, %v285_v47  ;;  %990 = vmatpush.xpose.msk.msrb.mxu2 %vm126_vm8, %v315_v48 }
 0x38c   :  { %991 = vmatmul.msk.f32.vlgmr.msrb.gmra.mxu2 %vm126_vm8, %v313_v49 }
 0x390   :  { %v393_v50 = vpop.permute.xlu0 %392 }
 0x391   :  { %413 = vmatpush.msra.mxu2 %v393_v50 }
 0x398   :  { %v447_v51 = vpop.permute.xlu0 %446 }
 0x399   :  { %994 = vmatpush.xpose.msk.msrb.mxu2 %vm126_vm8, %v447_v51 }
 0x3a0   :  { %v445_v8 = vpop.permute.xlu0 %444 }
 0x3a8   :  { %v605_v12 = vpop.permute.xlu0 %604 }
 0x3b0   :  { %v635_v23 = vpop.permute.xlu0 %634 }
 0x3f0   :  { %v1239_v52 = vpop.f32.mrf.mxu1 }
 0x3fe   :  { %v1241_v53 = vpop.f32.mrf.mxu1 }
 0x406   :  { %v309_v56 = vpop.f32.mrf.mxu1 }
 0x407   :  { %v340_v57 = vmul.f32 0.17677669, %v309_v56 }
 0x409   :  { %v342_v58 = vsel %vm1204_vm9, %v340_v57, -inf }
 0x40a   :  { %v344_v59 = vsel %vm126_vm8, %v342_v58, -inf }
 0x40b   :  { %345 = vmax.xlane.f32.xlu1 %v344_v59 }
 0x40f   :  { %v337_v4 = vpop.f32.mrf.mxu2 }
 0x410   :  { %v341_v5 = vmul.f32 0.17677669, %v337_v4 }
 0x412   :  { %v343_v6 = vsel %vm1204_vm9, %v341_v5, -inf }
 0x413   :  { %v347_v7 = vsel %vm126_vm8, %v343_v6, -inf }
 0x424   :  { %472 = vrot.lane.b32.xlu1 %v1195_v55, %s1102_s14 }
 0x47e   :  { %v346_v60 = vpop.xlane.xlu1 %345 }
 0x47f   :  { %v350_v61 = vsub.f32 %v342_v58, %v346_v60 }
 0x481   :  { %v352_v63 = vmul.f32 1.442695, %v350_v61 }
 0x483   :  { %1041 = vpow2.f32 %v352_v63 }
 0x489   :  { %v1042_v1 = vpop.eup %1041 }
 0x48a   :  { %v356_v3 = vsel %vm126_vm8, %v1042_v1, 0.0 }
 0x48b   :  { %357 = vadd.xlane.f32.xlu2 %v356_v3 }
 0x496   :  { %v473_v26 = vpop.permute.xlu1 %472 }
 0x4a3   :  { %606 = vrot.lane.b32.xlu2 %v1192_v54, %s1104_s16 }
 0x4ab   :  { %474 = vrot.lane.b32.xlu2 %v1195_v55, %s1101_s13 }
 0x4b3   :  { %632 = vrot.lane.b32.xlu2 %v1195_v55, %s1103_s15  ;;  %s968_s15 = sshll.u32 %s1462_s6, 4  ;;  %s969_s15 = int_to_ptr.hbm [resolvable:$true] %s968_s15 }
 0x4dc   :  { %348 = vmax.xlane.f32.xlu2 %v347_v7 }
 0x4fe   :  { %v358_v9 = vpop.xlane.xlu2 %357 }
 0x4ff   :  { %1043 = vrcp.f32 %v358_v9  ;;  %v373_v16 = vand.u32 2147483648, %v358_v9  ;;  %v371_v18 = vand.u32 2147483647, %v358_v9  ;;  %vm367_vm4 = vweird.f32 %v358_v9 }
 0x501   :  { %v374_v20 = vor.u32 1.1754944e-38, %v373_v16  ;;  %vm372_vm6 = vcmp.eq.f32.partialorder %v371_v18, 8.507059e+37 }
 0x505   :  { %v1044_v11 = vpop.eup %1043 }
 0x506   :  { %v363_v13 = vmul.f32 %v1044_v11, %v358_v9  ;;  %v607_v14 = vpop.permute.xlu2 %606  ;;  %vm368_vm3 = vweird.f32 %v1044_v11 }
 0x507   :  { %vm369_vm5 = vmor %vm367_vm4, %vm368_vm3 }
 0x508   :  { %v364_v15 = vsub.f32 1.0, %v363_v13 }
 0x50a   :  { %v365_v17 = vmul.f32 %v1044_v11, %v364_v15 }
 0x50c   :  { %v366_v19 = vadd.f32 %v1044_v11, %v365_v17 }
 0x50e   :  { %v370_v21 = vsel %vm369_vm5, %v1044_v11, %v366_v19  ;;  %v475_v22 = vpop.permute.xlu2 %474 }
 0x50f   :  { %v375_v24 = vsel %vm372_vm6, %v374_v20, %v370_v21  ;;  %996 = vmatpush.xpose.msk.msrb.mxu0 %vm126_vm8, %v475_v22 }
 0x510   :  { %v376_v25 = vmul.f32 %v1042_v1, %v375_v24 }
 0x512   :  { %992 = vmatmul.msk.f32.vlgmr.msra.gmra.mxu2 %vm126_vm8, %v376_v25  ;;  %997 = vmatmul.msk.f32.vlgmr.msrb.gmra.mxu0 %vm126_vm8, %v473_v26 }
 0x513   :  { %1002 = vmatpush.xpose.msk.msra.mxu0 %vm126_vm8, %v635_v23  ;;  %1000 = vmatpush.xpose.msk.msra.mxu2 %vm126_vm8, %v607_v14 }
 0x516   :  { %v633_v27 = vpop.permute.xlu2 %632 }
 0x51a   :  { %995 = vmatmul.msk.f32.vlgmr.msrb.gmra.mxu2 %vm126_vm8, %v445_v8  ;;  %1003 = vmatmul.msk.f32.vlgmr.msra.gmra.mxu0 %vm126_vm8, %v633_v27 }
 0x522   :  { %1001 = vmatmul.msk.f32.vlgmr.msra.gmra.mxu2 %vm126_vm8, %v605_v12 }
 0x54f   :  { %v349_v28 = vpop.xlane.xlu2 %348 }
 0x550   :  { %v351_v30 = vsub.f32 %v343_v6, %v349_v28 }
 0x552   :  { %v354_v32 = vmul.f32 1.442695, %v351_v30 }
 0x554   :  { %1045 = vpow2.f32 %v354_v32 }
 0x55a   :  { %v1269_v40 = vpop.eup %1045 }
 0x55b   :  { %v359_v44 = vsel %vm126_vm8, %v1269_v40, 0.0 }
 0x58f   :  { %v497_v29 = vpop.f32.mrf.mxu0 }
 0x590   :  { %v501_v43 = vmul.f32 0.17677669, %v497_v29 }
 0x592   :  { %v503_v47 = vsel %vm1204_vm9, %v501_v43, -inf }
 0x593   :  { %v507_v49 = vsel %vm126_vm8, %v503_v47, -inf }
 0x595   :  { %v415_v31 = vpop.f32.mrf.mxu2 }
 0x597   :  { %v657_v33 = vpop.f32.mrf.mxu0 }
 0x598   :  { %v661_v34 = vmul.f32 0.17677669, %v657_v33 }
 0x59a   :  { %v663_v35 = vsel %vm1204_vm9, %v661_v34, -inf }
 0x59b   :  { %v667_v37 = vsel %vm126_vm8, %v663_v35, -inf }
 0x59c   :  { %668 = vmax.xlane.f32.xlu2 %v667_v37 }
 0x59d   :  { %v469_v38 = vpop.f32.mrf.mxu2 }
 0x59e   :  { %v500_v39 = vmul.f32 0.17677669, %v469_v38 }
 0x5a0   :  { %v502_v41 = vsel %vm1204_vm9, %v500_v39, -inf }
 0x5a1   :  { %v504_v42 = vsel %vm126_vm8, %v502_v41, -inf }
 0x5a2   :  { %505 = vmax.xlane.f32.xlu0 %v504_v42 }
 0x5a4   :  { %360 = vadd.xlane.f32.xlu2 %v359_v44 }
 0x5a5   :  { %v629_v45 = vpop.f32.mrf.mxu2 }
 0x5a6   :  { %v660_v46 = vmul.f32 0.17677669, %v629_v45 }
 0x5a8   :  { %v662_v48 = vsel %vm1204_vm9, %v660_v46, -inf }
 0x5a9   :  { %v664_v50 = vsel %vm126_vm8, %v662_v48, -inf }
 0x5aa   :  { %508 = vmax.xlane.f32.xlu0 %v507_v49  ;;  %665 = vmax.xlane.f32.xlu1 %v664_v50 }
 0x5bc   :  { %552 = vrot.lane.b32.xlu2 %v1192_v54, %s1105_s17 }
 0x5c4   :  { %578 = vrot.lane.b32.xlu2 %v1195_v55, %s1105_s17  ;;  %s1111_s17 = smov 128  }
 0x60f   :  { %v669_v51 = vpop.xlane.xlu2 %668 }
 0x610   :  { %v671_v56 = vsub.f32 %v663_v35, %v669_v51 }
 0x612   :  { %v674_v57 = vmul.f32 1.442695, %v671_v56 }
 0x614   :  { %1047 = vpow2.f32 %v674_v57 }
 0x615   :  { %v506_v58 = vpop.xlane.xlu0 %505 }
 0x616   :  { %v510_v59 = vsub.f32 %v502_v41, %v506_v58 }
 0x617   :  { %v1284_v60 = vpop.xlane.xlu2 %360 }
 0x618   :  { %v512_v62 = vmul.f32 1.442695, %v510_v59  ;;  %v388_v46 = vand.u32 2147483648, %v1284_v60  ;;  %vm382_vm15 = vweird.f32 %v1284_v60 }
 0x61a   :  { %v1286_v61 = vpop.eup %1047  ;;  %1049 = vpow2.f32 %v512_v62  ;;  %v389_v59 = vor.u32 1.1754944e-38, %v388_v46 }
 0x61b   :  { %v679_v63 = vsel %vm126_vm8, %v1286_v61, 0.0 }
 0x61c   :  { %680 = vadd.xlane.f32.xlu0 %v679_v63 }
 0x61d   :  { %v666_v1 = vpop.xlane.xlu1 %665  ;;  %v509_v3 = vpop.xlane.xlu0 %508 }
 0x61e   :  { %v670_v4 = vsub.f32 %v662_v48, %v666_v1  ;;  %v511_v5 = vsub.f32 %v503_v47, %v509_v3  ;;  %v386_v48 = vand.u32 2147483647, %v1284_v60 }
 0x61f   :  { %v553_v6 = vpop.permute.xlu2 %552 }
 0x620   :  { %v1050_v7 = vpop.eup %1049  ;;  %v672_v8 = vmul.f32 1.442695, %v670_v4  ;;  %v514_v9 = vmul.f32 1.442695, %v511_v5  ;;  %573 = vmatpush.msra.mxu3 %v553_v6  ;;  %vm387_vm4 = vcmp.eq.f32.partialorder %v386_v48, 8.507059e+37 }
 0x621   :  { %v516_v11 = vsel %vm126_vm8, %v1050_v7, 0.0 }
 0x622   :  { %1051 = vpow2.f32 %v672_v8 }
 0x623   :  { %1053 = vpow2.f32 %v514_v9 }
 0x624   :  { %517 = vadd.xlane.f32.xlu0 %v516_v11  ;;  %1055 = vrcp.f32 %v1284_v60 }
 0x627   :  { %v579_v8 = vpop.permute.xlu2 %578 }
 0x628   :  { %v1291_v12 = vpop.eup %1051 }
 0x629   :  { %v1293_v13 = vpop.eup %1053  ;;  %v676_v15 = vsel %vm126_vm8, %v1291_v12, 0.0 }
 0x62a   :  { %v519_v14 = vsel %vm126_vm8, %v1293_v13, 0.0  ;;  %v1056_v18 = vpop.eup %1055 }
 0x62b   :  { %520 = vadd.xlane.f32.xlu1 %v519_v14  ;;  %v378_v22 = vmul.f32 %v1056_v18, %v1284_v60  ;;  %vm383_vm13 = vweird.f32 %v1056_v18 }
 0x62c   :  { %677 = vadd.xlane.f32.xlu0 %v676_v15  ;;  %vm384_vm2 = vmor %vm382_vm15, %vm383_vm13  ;;  %vm793_vm15 = vcmask 195584  }
 0x62d   :  { %v379_v26 = vsub.f32 1.0, %v378_v22 }
 0x62f   :  { %v380_v33 = vmul.f32 %v1056_v18, %v379_v26  ;;  %v797_v26 = vld [vmem:[%s1458_s2 + $0x8] sm:$0xff] }
 0x631   :  { %v381_v43 = vadd.f32 %v1056_v18, %v380_v33 }
 0x633   :  { %v385_v51 = vsel %vm384_vm2, %v1056_v18, %v381_v43 }
 0x634   :  { %v390_v1 = vsel %vm387_vm4, %v389_v59, %v385_v51 }
 0x640   :  { %712 = vrot.lane.b32.xlu0 %v1192_v54, %s1106_s18 }
 0x644   :  { %418 = vrot.lane.b32.xlu1 %v1195_v55, %s1100_s12 }
 0x648   :  { %766 = vrot.lane.b32.xlu0 %v415_v31, %s1107_s19 }
 0x64c   :  { %738 = vrot.lane.b32.xlu1 %v1195_v55, %s1106_s18 }
 0x68f   :  { %v1304_v16 = vpop.xlane.xlu0 %680 }
 0x697   :  { %v518_v17 = vpop.xlane.xlu0 %517 }
 0x698   :  { %1057 = vrcp.f32 %v518_v17  ;;  %v533_v24 = vand.u32 2147483648, %v518_v17  ;;  %v531_v25 = vand.u32 2147483647, %v518_v17  ;;  %vm527_vm9 = vweird.f32 %v518_v17 }
 0x69a   :  { %v534_v30 = vor.u32 1.1754944e-38, %v533_v24  ;;  %vm532_vm11 = vcmp.eq.f32.partialorder %v531_v25, 8.507059e+37  ;;  %v799_v25 = vld [vmem:[%s1458_s2 + $0x18] sm:$0xff] }
 0x69b   :  { %819 = vmatpush.msrb.mxu2 %v799_v25 }
 0x69e   :  { %v1058_v19 = vpop.eup %1057  ;;  %v1307_v20 = vpop.xlane.xlu1 %520 }
 0x69f   :  { %v523_v21 = vmul.f32 %v1058_v19, %v518_v17  ;;  %1059 = vrcp.f32 %v1307_v20  ;;  %v678_v54 = vpop.xlane.xlu0 %677  ;;  %vm528_vm7 = vweird.f32 %v1058_v19  ;;  %v548_v4 = vand.u32 2147483648, %v1307_v20 }
 0x6a0   :  { %1061 = vrcp.f32 %v678_v54  ;;  %vm529_vm10 = vmor %vm527_vm9, %vm528_vm7  ;;  %v693_v39 = vand.u32 2147483648, %v678_v54  ;;  %v691_v42 = vand.u32 2147483647, %v678_v54  ;;  %vm687_vm14 = vweird.f32 %v678_v54 }
 0x6a1   :  { %v524_v23 = vsub.f32 1.0, %v523_v21  ;;  %1063 = vrcp.f32 %v1304_v16  ;;  %vm542_vm6 = vweird.f32 %v1307_v20  ;;  %v546_v5 = vand.u32 2147483647, %v1307_v20 }
 0x6a2   :  { %v694_v49 = vor.u32 1.1754944e-38, %v693_v39  ;;  %vm692_vm3 = vcmp.eq.f32.partialorder %v691_v42, 8.507059e+37  ;;  %v708_v17 = vand.u32 2147483648, %v1304_v16  ;;  %v800_v42 = vperm.slane %v1186_v36, 4 }
 0x6a3   :  { %v525_v55 = vmul.f32 %v1058_v19, %v524_v23  ;;  %vm547_vm9 = vcmp.eq.f32.partialorder %v546_v5, 8.507059e+37 }
 0x6a4   :  { %v709_v21 = vor.u32 1.1754944e-38, %v708_v17 }
 0x6a5   :  { %v1311_v27 = vpop.eup %1059  ;;  %v526_v28 = vadd.f32 %v1058_v19, %v525_v55 }
 0x6a6   :  { %v1062_v29 = vpop.eup %1061  ;;  %v538_v34 = vmul.f32 %v1311_v27, %v1307_v20  ;;  %vm543_vm5 = vweird.f32 %v1311_v27 }
 0x6a7   :  { %v683_v31 = vmul.f32 %v1062_v29, %v678_v54  ;;  %v530_v32 = vsel %vm529_vm10, %v1058_v19, %v526_v28  ;;  %vm688_vm12 = vweird.f32 %v1062_v29  ;;  %v1064_v45 = vpop.eup %1063  ;;  %vm544_vm7 = vmor %vm542_vm6, %vm543_vm5 }
 0x6a8   :  { %v535_v35 = vsel %vm532_vm11, %v534_v30, %v530_v32  ;;  %v539_v44 = vsub.f32 1.0, %v538_v34  ;;  %vm689_vm1 = vmor %vm687_vm14, %vm688_vm12  ;;  %v698_v56 = vmul.f32 %v1064_v45, %v1304_v16  ;;  %vm703_vm10 = vweird.f32 %v1064_v45 }
 0x6a9   :  { %v684_v37 = vsub.f32 1.0, %v683_v31  ;;  %v536_v38 = vmul.f32 %v1050_v7, %v535_v35  ;;  %v391_v7 = vmul.f32 %v1269_v40, %v390_v1  ;;  %vm702_vm11 = vweird.f32 %v1304_v16  ;;  %v884_v1 = vld [vmem:[%s1459_s3 + $0x10] sm:$0xff] }
 0x6aa   :  { %v540_v57 = vmul.f32 %v1311_v27, %v539_v44  ;;  %v699_v3 = vsub.f32 1.0, %v698_v56  ;;  %v706_v40 = vand.u32 2147483647, %v1304_v16  ;;  %vm704_vm12 = vmor %vm702_vm11, %vm703_vm10  ;;  %vm790_vm14 = vcmask 130048  }
 0x6ab   :  { %v685_v41 = vmul.f32 %v1062_v29, %v684_v37  ;;  %998 = vmatmul.msk.f32.vlgmr.msra.gmra.mxu3 %vm126_vm8, %v536_v38 }
 0x6ac   :  { %v541_v60 = vadd.f32 %v1311_v27, %v540_v57  ;;  %v700_v9 = vmul.f32 %v1064_v45, %v699_v3  ;;  %vm707_vm13 = vcmp.eq.f32.partialorder %v706_v40, 8.507059e+37  ;;  %v883_v3 = vld [vmem:[%s1459_s3 + $0x8] sm:$0xff]  ;;  %v930_v40 = vld [vmem:[%s1460_s4 + $0x60] sm:$0xff] }
 0x6ad   :  { %v686_v47 = vadd.f32 %v1062_v29, %v685_v41 }
 0x6ae   :  { %v545_v11 = vsel %vm544_vm7, %v1311_v27, %v541_v60  ;;  %v701_v15 = vadd.f32 %v1064_v45, %v700_v9  ;;  %v796_v27 = vld [vmem:[%s1458_s2] sm:$0xff]  ;;  %v932_v9 = vld [vmem:[%s1460_s4 + $0x70] sm:$0xff] }
 0x6af   :  { %v690_v50 = vsel %vm689_vm1, %v1062_v29, %v686_v47  ;;  %v882_v60 = vld [vmem:[%s1459_s3] sm:$0xff] }
 0x6b0   :  { %v695_v58 = vsel %vm692_vm3, %v694_v49, %v690_v50  ;;  %v705_v20 = vsel %vm704_vm12, %v1064_v45, %v701_v15 }
 0x6b1   :  { %v696_v62 = vmul.f32 %v1291_v12, %v695_v58  ;;  %v549_v12 = vor.u32 1.1754944e-38, %v548_v4  ;;  %v710_v54 = vsel %vm707_vm13, %v709_v21, %v705_v20  ;;  %v929_v20 = vld [vmem:[%s1460_s4 + $0x58] sm:$0xff] }
 0x6b2   :  { %v713_v63 = vpop.permute.xlu0 %712  ;;  %v711_v22 = vmul.f32 %v1286_v61, %v710_v54  ;;  %v798_v61 = vld [vmem:[%s1458_s2 + $0x10] sm:$0xff] }
 0x6b3   :  { %733 = vmatpush.msrb.mxu3 %v713_v63  ;;  %v550_v14 = vsel %vm547_vm9, %v549_v12, %v545_v11  ;;  %820 = vmatpush.msrb.mxu2 %v798_v61  ;;  %v885_v63 = vld [vmem:[%s1459_s3 + $0x18] sm:$0xff]  ;;  %v931_v12 = vld [vmem:[%s1460_s4 + $0x68] sm:$0xff]  ;;  %v928_v54 = vld [vmem:[%s1460_s4 + $0x50] sm:$0xff]  ;;  %s1110_s3 = smov [#allocation2]  }
 0x6b4   :  { %1004 = vmatmul.msk.f32.vlgmr.msrb.gmra.mxu3 %vm126_vm8, %v696_v62  ;;  %v551_v19 = vmul.f32 %v1293_v13, %v550_v14  ;;  %905 = vmatpush.msrb.mxu0 %v885_v63  ;;  %s966_s16 = sshll.u32 %s1110_s3, 4  ;;  %s967_s16 = int_to_ptr.vmem [resolvable:$true] %s966_s16 }
 0x6b5   :  { %821 = vmatpush.msrb.mxu2 %v797_v26  ;;  %v925_v26 = vld [vmem:[%s1460_s4 + $0x38] sm:$0xff] }
 0x6b6   :  { %v419_v6 = vpop.permute.xlu1 %418  ;;  %906 = vmatpush.msrb.mxu0 %v884_v1 }
 0x6b7   :  { %439 = vmatpush.msra.mxu1 %v419_v6  ;;  %822 = vmatpush.msrb.mxu2 %v796_v27 }
 0x6b8   :  { %993 = vmatmul.msk.f32.vlgmr.msra.gmra.mxu1 %vm126_vm8, %v391_v7  ;;  %907 = vmatpush.msrb.mxu0 %v883_v3 }
 0x6b9   :  { %599 = vmatpush.msrb.mxu1 %v579_v8  ;;  %v933_v8 = vld [vmem:[%s1460_s4 + $0x78] sm:$0xff] }
 0x6ba   :  { %v767_v28 = vpop.permute.xlu0 %766  ;;  %908 = vmatpush.msrb.mxu0 %v882_v60  ;;  %935 = vmatpush.msra.mxu3 %v933_v8 }
 0x6bb   :  { %v788_v30 = vsel %vm126_vm8, %v1239_v52, %v767_v28 }
 0x6bc   :  { %936 = vmatpush.msra.mxu3 %v932_v9 }
 0x6be   :  { %v739_v18 = vpop.permute.xlu1 %738  ;;  %937 = vmatpush.msra.mxu3 %v931_v12 }
 0x6bf   :  { %759 = vmatpush.msra.mxu1 %v739_v18 }
 0x6c0   :  { %999 = vmatmul.msk.f32.vlgmr.msrb.gmra.mxu1 %vm126_vm8, %v551_v19  ;;  %938 = vmatpush.msra.mxu3 %v930_v40 }
 0x6c2   :  { %939 = vmatpush.msra.mxu3 %v929_v20 }
 0x6c4   :  { %940 = vmatpush.msra.mxu3 %v928_v54 }
 0x6c8   :  { %1005 = vmatmul.msk.f32.vlgmr.msra.gmra.mxu1 %vm126_vm8, %v711_v22  ;;  %v876_v22 = vperm.slane %v1186_v36, 2 }
 0x72e   :  { %v575_v23 = vpop.f32.mrf.mxu3 }
 0x72f   :  { %774 = vrot.lane.b32.xlu2 %v575_v23, %s1108_s20  ;;  %v927_v23 = vld [vmem:[%s1460_s4 + $0x48] sm:$0xff] }
 0x730   :  { %941 = vmatpush.msra.mxu3 %v927_v23 }
 0x735   :  { %v441_v24 = vpop.f32.mrf.mxu1 }
 0x736   :  { %768 = vrot.lane.b32.xlu0 %v441_v24, %s1107_s19 }
 0x737   :  { %v735_v16 = vpop.f32.mrf.mxu3 }
 0x738   :  { %782 = vrot.lane.b32.xlu1 %v735_v16, %s1109_s21 }
 0x73d   :  { %v601_v13 = vpop.f32.mrf.mxu1 }
 0x73e   :  { %776 = vrot.lane.b32.xlu2 %v601_v13, %s1108_s20  ;;  %v879_v13 = vperm.slane %v1186_v36, 3 }
 0x745   :  { %v761_v55 = vpop.f32.mrf.mxu1 }
 0x746   :  { %784 = vrot.lane.b32.xlu1 %v761_v55, %s1109_s21  ;;  %v926_v55 = vld [vmem:[%s1460_s4 + $0x40] sm:$0xff] }
 0x747   :  { %942 = vmatpush.msra.mxu3 %v926_v55 }
 0x749   :  { %943 = vmatpush.msra.mxu3 %v925_v26 }
 0x789   :  { %v775_v29 = vpop.permute.xlu2 %774 }
 0x78a   :  { %v791_v31 = vsel %vm790_vm14, %v788_v30, %v775_v29  ;;  %v924_v29 = vld [vmem:[%s1460_s4 + $0x30] sm:$0xff] }
 0x78b   :  { %944 = vmatpush.msra.mxu3 %v924_v29 }
 0x798   :  { %v777_v37 = vpop.permute.xlu2 %776 }
 0x7a8   :  { %v769_v34 = vpop.permute.xlu0 %768 }
 0x7a9   :  { %v789_v35 = vsel %vm126_vm8, %v1241_v53, %v769_v34 }
 0x7aa   :  { %v783_v32 = vpop.permute.xlu1 %782  ;;  %v792_v39 = vsel %vm790_vm14, %v789_v35, %v777_v37  ;;  %v921_v35 = vld [vmem:[%s1460_s4 + $0x18] sm:$0xff] }
 0x7ab   :  { %v794_v33 = vsel %vm793_vm15, %v791_v31, %v783_v32  ;;  %v923_v31 = vld [vmem:[%s1460_s4 + $0x28] sm:$0xff] }
 0x7ac   :  { %1006 = vmatmul.msk.f32.vlgmr.msrb.gmra.mxu2 %vm27_vm0, %v794_v33  ;;  %v922_v33 = vld [vmem:[%s1460_s4 + $0x20] sm:$0xff]  ;;  %945 = vmatpush.msra.mxu3 %v923_v31 }
 0x7ae   :  { %946 = vmatpush.msra.mxu3 %v922_v33 }
 0x7b0   :  { %947 = vmatpush.msra.mxu3 %v921_v35 }
 0x7b8   :  { %v785_v38 = vpop.permute.xlu1 %784 }
 0x7b9   :  { %v795_v41 = vsel %vm793_vm15, %v792_v39, %v785_v38 }
 0x7ba   :  { %1007 = vmatmul.msk.f32.gmra.mxu2 %vm27_vm0, %v795_v41 }
 0x82f   :  { %v824_v43 = vpop.f32.mrf.mxu2 }
 0x830   :  { %v825_v44 = vadd.f32 %v824_v43, %v800_v42  ;;  %v920_v43 = vld [vmem:[%s1460_s4 + $0x10] sm:$0xff] }
 0x831   :  { %948 = vmatpush.msra.mxu3 %v920_v43 }
 0x832   :  { %v1360_v52 = vadd.f32 %v825_v44, %v1150_v0  ;;  %v919_v44 = vld [vmem:[%s1460_s4 + $0x8] sm:$0xff] }
 0x833   :  { %949 = vmatpush.msra.mxu3 %v919_v44 }
 0x834   :  { %v832_v45 = vsel %vm27_vm0, %v1360_v52, 0.0 }
 0x835   :  { %833 = vadd.xlane.f32.xlu0 %v832_v45  ;;  %v918_v45 = vld [vmem:[%s1460_s4] sm:$0xff] }
 0x836   :  { %950 = vmatpush.msra.mxu3 %v918_v45 }
 0x83d   :  { %v827_v46 = vpop.f32.mrf.mxu2 }
 0x83e   :  { %v828_v47 = vadd.f32 %v827_v46, %v800_v42  ;;  %v886_v46 = vperm.slane %v1186_v36, 6 }
 0x840   :  { %v1365_v53 = vadd.f32 %v828_v47, %v1157_v2 }
 0x842   :  { %v835_v48 = vsel %vm27_vm0, %v1365_v53, 0.0 }
 0x843   :  { %836 = vadd.xlane.f32.xlu2 %v835_v48 }
 0x8a8   :  { %v834_v49 = vpop.xlane.xlu0 %833 }
 0x8a9   :  { %v838_v50 = vmul.f32 %v834_v49, %v1161_v10 }
 0x8ab   :  { %v840_v51 = vsub.f32 %v1360_v52, %v838_v50 }
 0x8ad   :  { %v842_v0 = vmul.f32 %v840_v51, %v840_v51 }
 0x8af   :  { %v844_v56 = vsel %vm27_vm0, %v842_v0, 0.0 }
 0x8b0   :  { %845 = vadd.xlane.f32.xlu1 %v844_v56  ;;  %v934_v56 = vperm.slane %v1186_v36, 5 }
 0x8b6   :  { %v837_v57 = vpop.xlane.xlu2 %836 }
 0x8b7   :  { %v839_v58 = vmul.f32 %v837_v57, %v1161_v10 }
 0x8b9   :  { %v1374_v59 = vsub.f32 %v1365_v53, %v839_v58 }
 0x8bb   :  { %v843_v2 = vmul.f32 %v1374_v59, %v1374_v59 }
 0x8bd   :  { %v847_v62 = vsel %vm27_vm0, %v843_v2, 0.0 }
 0x8be   :  { %848 = vadd.xlane.f32.xlu2 %v847_v62 }
 0x923   :  { %v846_v4 = vpop.xlane.xlu1 %845 }
 0x924   :  { %v850_v5 = vmul.f32 %v846_v4, %v1161_v10 }
 0x926   :  { %v852_v6 = vadd.f32 1e-05, %v850_v5 }
 0x928   :  { %1065 = vrsqrt.f32 %v852_v6  ;;  %vm860_vm1 = vweird.f32 %v852_v6 }
 0x92e   :  { %v1066_v7 = vpop.eup %1065 }
 0x92f   :  { %v855_v11 = vmul.f32 %v1066_v7, %v852_v6  ;;  %vm861_vm8 = vweird.f32 %v1066_v7 }
 0x930   :  { %vm862_vm2 = vmor %vm860_vm1, %vm861_vm8 }
 0x931   :  { %v856_v14 = vmul.f32 %v1066_v7, %v855_v11  ;;  %v849_v15 = vpop.xlane.xlu2 %848 }
 0x932   :  { %v851_v17 = vmul.f32 %v849_v15, %v1161_v10 }
 0x933   :  { %v857_v18 = vmul.f32 0.5, %v856_v14 }
 0x934   :  { %v853_v19 = vadd.f32 1e-05, %v851_v17 }
 0x935   :  { %v858_v21 = vsub.f32 1.5, %v857_v18 }
 0x936   :  { %1067 = vrsqrt.f32 %v853_v19  ;;  %vm870_vm4 = vweird.f32 %v853_v19 }
 0x937   :  { %v859_v10 = vmul.f32 %v1066_v7, %v858_v21 }
 0x939   :  { %v863_v24 = vsel %vm862_vm2, %v1066_v7, %v859_v10 }
 0x93a   :  { %v874_v16 = vmul.f32 %v863_v24, %v840_v51 }
 0x93c   :  { %v1068_v25 = vpop.eup %1067  ;;  %v877_v61 = vmul.f32 %v876_v22, %v874_v16 }
 0x93d   :  { %v865_v27 = vmul.f32 %v1068_v25, %v853_v19  ;;  %vm871_vm3 = vweird.f32 %v1068_v25 }
 0x93e   :  { %v880_v28 = vadd.f32 %v879_v13, %v877_v61  ;;  %vm872_vm5 = vmor %vm870_vm4, %vm871_vm3 }
 0x93f   :  { %v866_v30 = vmul.f32 %v1068_v25, %v865_v27 }
 0x940   :  { %1008 = vmatmul.msk.f32.vlgmr.msrb.gmra.mxu0 %vm27_vm0, %v880_v28 }
 0x941   :  { %v867_v32 = vmul.f32 0.5, %v866_v30 }
 0x943   :  { %v868_v34 = vsub.f32 1.5, %v867_v32 }
 0x945   :  { %v869_v37 = vmul.f32 %v1068_v25, %v868_v34 }
 0x947   :  { %v873_v38 = vsel %vm872_vm5, %v1068_v25, %v869_v37 }
 0x948   :  { %v875_v39 = vmul.f32 %v873_v38, %v1374_v59 }
 0x94a   :  { %v878_v41 = vmul.f32 %v876_v22, %v875_v39 }
 0x94c   :  { %v881_v42 = vadd.f32 %v879_v13, %v878_v41 }
 0x94e   :  { %1009 = vmatmul.msk.f32.gmra.mxu0 %vm27_vm0, %v881_v42 }
 0x9bd   :  { %v910_v47 = vpop.f32.mrf.mxu0 }
 0x9be   :  { %v911_v48 = vadd.f32 %v910_v47, %v886_v46 }
 0x9c0   :  { %v916_v49 = vmax.f32 %v911_v48, 0.0 }
 0x9c2   :  { %951 = vmatmul.f32.vlgmr.msra.gmra.mxu3 %v916_v49 }
 0x9cb   :  { %v913_v50 = vpop.f32.mrf.mxu0 }
 0x9cc   :  { %v914_v51 = vadd.f32 %v913_v50, %v886_v46 }
 0x9ce   :  { %v917_v0 = vmax.f32 %v914_v51, 0.0 }
 0x9d0   :  { %954 = vmatmul.f32.gmra.mxu3 %v917_v0 }
 0xa45   :  { %v952_v57 = vpop.f32.mrf.mxu3 }
 0xa46   :  { %v953_v58 = vadd.f32 %v952_v57, %v934_v56 }
 0xa48   :  { %v958_v59 = vadd.f32 %v953_v58, %v1360_v52 }
 0xa4a   :  { %960 = vst.msk [vmem:[#allocation2] sm:$0xff] %vm27_vm0, %v958_v59 }
 0xa53   :  { %v955_v2 = vpop.f32.mrf.mxu3 }
 0xa54   :  { %v956_v62 = vadd.f32 %v955_v2, %v934_v56 }
 0xa56   :  { %v959_v63 = vadd.f32 %v956_v62, %v1365_v53 }
 0xa58   :  { %961 = vst.msk [vmem:[#allocation2 + $0x8] sm:$0xff] %vm27_vm0, %v959_v63 }
 0xa59   :  { %974 = dma.vmem_to_hbm [thread:$0]  %s967_s16, 256, %s969_s15, [#allocation3], %s1111_s17, %s1111_s17, %s1107_s19  }
 0xa5a   :  { %1093 = dma.done.wait [#allocation3], 256  }
 0xa5b   :  { %1094 = vsyncadd [#allocation3], 4294967040 }
 0xa5c   :  { %979 = vsyncpa [#allocation3], 1 }

</bundles_post_ra>
